<compile_context>
chip_gen: v7x
topology: tpu7x:2x2x1
jax: 0.10.0
libtpu: 0.0.40
codegen_flags: <defaults>
</compile_context>

<pallas_src>
import functools

import jax
import jax.numpy as jnp
from jax import lax
from jax.experimental import pallas as pl
from jax.experimental.pallas import tpu as pltpu


def _round_up(x, m):
    return (x + m - 1) // m * m


def _langpuller_kernel(novel_ref, base_ref, w_ref, o_ref, *, inv_temp, mask):
    # novel_ref: (Nn, D) bf16, base_ref: (Nb, D) bf16, w_ref: (Nb, tw) bf16
    novel = novel_ref[...]
    base = base_ref[...]

    # scores = novel @ base.T without an in-kernel transpose: contract the
    # last (D) axis of both operands directly on the MXU, accumulate in f32.
    scores = lax.dot_general(
        novel, base,
        dimension_numbers=(((1,), (1,)), ((), ())),
        preferred_element_type=jnp.float32)                  # (Nn, Nb) f32

    if mask:
        # torch fill_diagonal_(-9999) happens BEFORE the temperature divide.
        nn_, nb_ = scores.shape
        row = lax.broadcasted_iota(jnp.int32, (nn_, nb_), 0)
        col = lax.broadcasted_iota(jnp.int32, (nn_, nb_), 1)
        scores = jnp.where(row == col, jnp.float32(-9999.0), scores)

    # temperature divide folded into a constant multiply (f32, VPU).
    scores = scores * jnp.float32(inv_temp)

    # Numerically stable softmax along dim=1, all in f32.
    m = jnp.max(scores, axis=1, keepdims=True)
    e = jnp.exp(scores - m)
    denom = jnp.sum(e, axis=1, keepdims=True)
    p = e * pl.reciprocal(denom, approx=True)                # (Nn, Nb) f32

    # Second matmul: bf16 operands on the MXU, f32 accumulation.
    o_ref[...] = jnp.dot(p.astype(jnp.bfloat16), w_ref[...],
                         preferred_element_type=jnp.float32)


def lang_puller_forward(novel_embeds, base_embeds, base_weight,
                        temperature=1.0, mask=False):
    """Pallas implementation of LangPuller.forward (mapping_model is None)."""
    nn_, d = novel_embeds.shape
    nb_, d2 = base_embeds.shape
    assert d == d2
    nb2_, w = base_weight.shape
    assert nb_ == nb2_

    # bf16 at the MXU boundary: halves HBM->VMEM bytes, doubles MXU rate.
    novel_bf = novel_embeds.astype(jnp.bfloat16)
    base_bf = base_embeds.astype(jnp.bfloat16)
    w_bf = base_weight.astype(jnp.bfloat16)

    # Lane-dense output: pad W to a multiple of 128 (zero columns, sliced off).
    w_pad = _round_up(w, 128)
    if w_pad != w:
        w_bf = jnp.pad(w_bf, ((0, 0), (0, w_pad - w)))

    # Tile W so the only potentially-large operand (base_weight) is streamed /
    # double-buffered by the BlockSpec pipeline; keeps VMEM use small on v7x.
    tw = w_pad if w_pad <= 2048 else 512
    n_tiles = w_pad // tw

    kernel = functools.partial(_langpuller_kernel,
                               inv_temp=1.0 / float(temperature),
                               mask=bool(mask))

    flops = 2 * nn_ * d * nb_ * n_tiles + 2 * nn_ * nb_ * w_pad
    bytes_accessed = (nn_ * d + nb_ * d + nb_ * w_pad) * 2 + nn_ * w_pad * 4

    out = pl.pallas_call(
        kernel,
        out_shape=jax.ShapeDtypeStruct((nn_, w_pad), jnp.float32),
        grid_spec=pltpu.PrefetchScalarGridSpec(
            num_scalar_prefetch=0,
            grid=(n_tiles,),
            in_specs=[
                pl.BlockSpec((nn_, d), lambda j: (0, 0)),   # novel (resident)
                pl.BlockSpec((nb_, d), lambda j: (0, 0)),   # base  (resident)
                pl.BlockSpec((nb_, tw), lambda j: (0, j)),  # base_weight tile
            ],
            out_specs=pl.BlockSpec((nn_, tw), lambda j: (0, j)),
        ),
        compiler_params=pltpu.CompilerParams(
            dimension_semantics=("parallel",)),
        cost_estimate=pl.CostEstimate(
            flops=flops,
            transcendentals=nn_ * nb_,
            bytes_accessed=bytes_accessed),
    )(novel_bf, base_bf, w_bf)

    return out[:, :w] if w_pad != w else out


def _reference(novel_embeds, base_embeds, base_weight, temperature, mask):
    scores = novel_embeds @ base_embeds.T
    if mask:
        n = min(scores.shape)
        scores = scores.at[jnp.arange(n), jnp.arange(n)].set(-9999.0)
    scores = jax.nn.softmax(scores / temperature, axis=1)
    return scores @ base_weight


if __name__ == "__main__":
    # Deterministic synthetic "embeddings" / weights (the module normally loads
    # word embeddings from pickles; here we init in-script).
    key = jax.random.PRNGKey(0)
    k1, k2, k3 = jax.random.split(key, 3)

    n_novel = 8           # number of novel classes
    n_base = 16           # number of base classes
    embed_dim = 32        # opt.word_embed_size
    weight_dim = 64       # base classifier weight dim (640 in the paper)
    temperature = 2.0     # opt.temperature

    novel_embeds = jax.random.normal(k1, (n_novel, embed_dim), dtype=jnp.float32)
    base_embeds = jax.random.normal(k2, (n_base, embed_dim), dtype=jnp.float32)
    base_weight = jax.random.normal(k3, (n_base, weight_dim), dtype=jnp.float32)

    out = jax.block_until_ready(
        lang_puller_forward(novel_embeds, base_embeds, base_weight,
                            temperature=temperature, mask=False))
    ref = _reference(novel_embeds, base_embeds, base_weight, temperature, False)
    assert out.shape == (n_novel, weight_dim)
    # bf16 MXU operands + approx reciprocal -> loosened tolerance vs f32 ref.
    assert jnp.allclose(out, ref, atol=5e-2, rtol=5e-2), \
        f"max abs diff {jnp.max(jnp.abs(out - ref))}"

    # Also exercise the mask=True path (fill_diagonal_(-9999) before /temp).
    out_m = jax.block_until_ready(
        lang_puller_forward(novel_embeds, base_embeds, base_weight,
                            temperature=temperature, mask=True))
    ref_m = _reference(novel_embeds, base_embeds, base_weight, temperature, True)
    assert jnp.allclose(out_m, ref_m, atol=5e-2, rtol=5e-2), \
        f"max abs diff {jnp.max(jnp.abs(out_m - ref_m))}"

    # TODO(synk): mapping_model (LinearMap) branch and get_projected_weight
    # (QR decomposition) are not on the default forward hot path and are left
    # to plain JAX (jnp.linalg.qr) rather than faked in Pallas.
    print("KERNEL_OK")
</pallas_src>

<mosaic_0001>
module attributes {stable_mosaic.version = 11 : i64} {
  func.func @_langpuller_kernel(%arg0: i32, %arg1: memref<8x32xbf16, #tpu.memory_space<vmem>>, %arg2: memref<16x32xbf16, #tpu.memory_space<vmem>>, %arg3: memref<16x128xbf16, #tpu.memory_space<vmem>>, %arg4: memref<8x128xf32, #tpu.memory_space<vmem>>) attributes {dimension_semantics = [#tpu.dimension_semantics<parallel>], iteration_bounds = array<i64: 1>, scalar_prefetch = 0 : i64, scratch_operands = 0 : i64, tpu.core_type = #tpu.core_type<tc>, window_params = [{pipeline_mode = #tpu.pipeline_mode<synchronous>, transform_indices = @transform_0, window_bounds = array<i64: 8, 32>}, {pipeline_mode = #tpu.pipeline_mode<synchronous>, transform_indices = @transform_1, window_bounds = array<i64: 16, 32>}, {transform_indices = @transform_2, window_bounds = array<i64: 16, 128>}, {transform_indices = @transform_3, window_bounds = array<i64: 8, 128>}]} {
    %c0 = arith.constant 0 : index
    %c0_0 = arith.constant 0 : index
    %0 = vector.load %arg1[%c0, %c0_0] : memref<8x32xbf16, #tpu.memory_space<vmem>>, vector<8x32xbf16>
    %c0_1 = arith.constant 0 : index
    %c0_2 = arith.constant 0 : index
    %1 = vector.load %arg2[%c0_1, %c0_2] : memref<16x32xbf16, #tpu.memory_space<vmem>>, vector<16x32xbf16>
    %cst = arith.constant dense<0.000000e+00> : vector<8x16xf32>
    %2 = tpu.matmul %0, %1, %cst {dimension_numbers = #tpu.dot_dimension_numbers<[1], [1], [0], [0], [0, 0, 1, 0], [], []>} : vector<8x32xbf16>, vector<16x32xbf16>, vector<8x16xf32> -> vector<8x16xf32>
    %cst_3 = arith.constant 5.000000e-01 : f32
    %3 = vector.broadcast %cst_3 : f32 to vector<8x16xf32>
    %4 = arith.mulf %2, %3 : vector<8x16xf32>
    %cst_4 = arith.constant dense<0xFF800000> : vector<8xf32>
    %5 = vector.multi_reduction <maximumf>, %4, %cst_4 [1] : vector<8x16xf32> to vector<8xf32>
    %6 = vector.shape_cast %5 : vector<8xf32> to vector<8x1xf32>
    %7 = vector.broadcast %6 : vector<8x1xf32> to vector<8x16xf32>
    %8 = arith.subf %4, %7 : vector<8x16xf32>
    %9 = math.exp %8 : vector<8x16xf32>
    %cst_5 = arith.constant dense<0.000000e+00> : vector<8xf32>
    %10 = vector.multi_reduction <add>, %9, %cst_5 [1] : vector<8x16xf32> to vector<8xf32>
    %11 = vector.shape_cast %10 : vector<8xf32> to vector<8x1xf32>
    %12 = tpu.reciprocal %11 {approx = true} : vector<8x1xf32> -> vector<8x1xf32>
    %13 = vector.broadcast %12 : vector<8x1xf32> to vector<8x16xf32>
    %14 = arith.mulf %9, %13 : vector<8x16xf32>
    %15 = arith.truncf %14 : vector<8x16xf32> to vector<8x16xbf16>
    %c0_6 = arith.constant 0 : index
    %c0_7 = arith.constant 0 : index
    %16 = vector.load %arg3[%c0_6, %c0_7] : memref<16x128xbf16, #tpu.memory_space<vmem>>, vector<16x128xbf16>
    %cst_8 = arith.constant dense<0.000000e+00> : vector<8x128xf32>
    %17 = tpu.matmul %15, %16, %cst_8 {dimension_numbers = #tpu.dot_dimension_numbers<[1], [0], [0], [1], [0, 0, 1, 1], [], []>} : vector<8x16xbf16>, vector<16x128xbf16>, vector<8x128xf32> -> vector<8x128xf32>
    %c0_9 = arith.constant 0 : index
    %c0_10 = arith.constant 0 : index
    %18 = vector.load %arg4[%c0_9, %c0_10] : memref<8x128xf32, #tpu.memory_space<vmem>>, vector<8x128xf32>
    tpu.vector_store %arg4[%c0_9, %c0_10], %17 {strides = array<i32>} : memref<8x128xf32, #tpu.memory_space<vmem>>, vector<8x128xf32>,
    return
  }
  func.func @transform_0(%arg0: i32) -> (i32, i32) {
    %c0_i32 = arith.constant 0 : i32
    %c0_i32_0 = arith.constant 0 : i32
    %c0_i32_1 = arith.constant 0 : i32
    return %c0_i32, %c0_i32_0 : i32, i32
  }
  func.func @transform_1(%arg0: i32) -> (i32, i32) {
    %c0_i32 = arith.constant 0 : i32
    %c0_i32_0 = arith.constant 0 : i32
    %c0_i32_1 = arith.constant 0 : i32
    return %c0_i32, %c0_i32_0 : i32, i32
  }
  func.func @transform_2(%arg0: i32) -> (i32, i32) {
    %c0_i32 = arith.constant 0 : i32
    %c0_i32_0 = arith.constant 0 : i32
    return %c0_i32, %arg0 : i32, i32
  }
  func.func @transform_3(%arg0: i32) -> (i32, i32) {
    %c0_i32 = arith.constant 0 : i32
    %c0_i32_0 = arith.constant 0 : i32
    return %c0_i32, %arg0 : i32, i32
  }
}

</mosaic_0001>

<bundles_post_ra>
// kernel: tpu_custom_call.1
= control target key start
LH: loop header
LB: loop body
LE: loop exit
PB: predicated region body
PF: predicated region fallthrough
CT: control target
= control target key end

     0   :  { %8 = vsyncpa [#allocation3], 0  ;;  %s405_s0 = inlined_call_operand.hbm [shape: bf16[8,32], index: 0, kind: input, shape index: {}]   ;;  %s406_s1 = inlined_call_operand.hbm [shape: bf16[16,32], index: 1, kind: input, shape index: {}]   ;;  %s407_s2 = inlined_call_operand.hbm [shape: bf16[16,128], index: 2, kind: input, shape index: {}]   ;;  %s408_s3 = inlined_call_operand.hbm [shape: f32[8,128], index: 3, kind: output, shape index: {}]  }
   0x1   :  { %9 = vsyncpa [#allocation6], 0 }
   0x2   :  { %10 = vsyncpa [#allocation4], 0  ;;  %s320_s12 = smov [#allocation5]   ;;  %s226_s16 = scalar_lea.hbm %s406_s1, 128 }
   0x3   :  { %s26_s13 = sshll.u32 %s320_s12, 4  ;;  %p227_p0 = scmp.ne.s32.totalorder %s406_s1, %s226_s16  ;;  %s27_s13 = int_to_ptr.vmem [resolvable:$true] %s26_s13 }
   0x4   :  { %p230_p1 = scmp.lt.u32.totalorder %s226_s16, %s406_s1 }
   0x6   :  { %p232_p2 = pnand %p230_p1, %p227_p0 }
   0x8   :  { %235 = shalt.err (!%p232_p2)
}
   0x9   :  { %s236_s21 = scalar_lea.vmem %s27_s13, 128  ;;  %p241_p4 = scmp.lt.s32.totalorder %s27_s13, %s27_s13 }
   0xa   :  { %p237_p3 = scmp.ne.s32.totalorder %s27_s13, %s236_s21  ;;  %p242_p5 = scmp.lt.s32.totalorder %s236_s21, %s236_s21 }
   0xc   :  { %p243_p6 = por %p242_p5, %p241_p4 }
   0xe   :  { %p244_p7 = pnand %p243_p6, %p237_p3 }
  0x10   :  { %247 = shalt.err (!%p244_p7)
}
  0x11   :  { %s321_s22 = smov 64   ;;  %s322_s23 = smov 4  }
  0x12   :  { %32 = dma.hbm_to_vmem [thread:$0]  %s406_s1, 128, %s27_s13, [#allocation6], %s321_s22, %s321_s22, %s322_s23  }
  0x13   :  { %s323_s26 = smov [#allocation2]   ;;  %s324_s28 = smov [#allocation7]  }
  0x14   :  { %s17_s27 = sshll.u32 %s323_s26, 4  ;;  %s38_s29 = sshll.u32 %s324_s28, 4  ;;  %s18_s27 = int_to_ptr.vmem [resolvable:$true] %s17_s27  ;;  %s39_s29 = int_to_ptr.vmem [resolvable:$true] %s38_s29 }
  0x15   :  { %s248_s5 = scalar_lea.hbm %s405_s0, 64 }
  0x16   :  { %p249_p8 = scmp.ne.s32.totalorder %s405_s0, %s248_s5  ;;  %p252_p9 = scmp.lt.u32.totalorder %s248_s5, %s405_s0 }
  0x18   :  { %p254_p10 = pnand %p252_p9, %p249_p8 }
  0x1a   :  { %257 = shalt.err (!%p254_p10)
}
  0x1b   :  { %s258_s1 = scalar_lea.vmem %s18_s27, 64  ;;  %p263_p12 = scmp.lt.s32.totalorder %s18_s27, %s18_s27 }
  0x1c   :  { %p259_p11 = scmp.ne.s32.totalorder %s18_s27, %s258_s1  ;;  %p264_p13 = scmp.lt.s32.totalorder %s258_s1, %s258_s1 }
  0x1e   :  { %p265_p0 = por %p264_p13, %p263_p12 }
  0x20   :  { %p266_p1 = pnand %p265_p0, %p259_p11 }
  0x22   :  { %269 = shalt.err (!%p266_p1)
}
  0x23   :  { %20 = dma.hbm_to_vmem [thread:$0]  %s405_s0, 64, %s18_s27, [#allocation3]  }
  0x24   :  { %s270_s14 = scalar_lea.hbm %s407_s2, 128 }
  0x25   :  { %p271_p2 = scmp.ne.s32.totalorder %s407_s2, %s270_s14  ;;  %p274_p3 = scmp.lt.u32.totalorder %s270_s14, %s407_s2 }
  0x27   :  { %p276_p4 = pnand %p274_p3, %p271_p2 }
  0x29   :  { %279 = shalt.err (!%p276_p4)
}
  0x2a   :  { %s280_s19 = scalar_lea.vmem %s39_s29, 128  ;;  %p285_p6 = scmp.lt.s32.totalorder %s39_s29, %s39_s29 }
  0x2b   :  { %p281_p5 = scmp.ne.s32.totalorder %s39_s29, %s280_s19  ;;  %p286_p7 = scmp.lt.s32.totalorder %s280_s19, %s280_s19 }
  0x2d   :  { %p287_p8 = por %p286_p7, %p285_p6 }
  0x2f   :  { %p288_p9 = pnand %p287_p8, %p281_p5 }
  0x31   :  { %291 = shalt.err (!%p288_p9)
}
  0x32   :  { %44 = dma.hbm_to_vmem [thread:$0]  %s407_s2, 128, %s39_s29, [#allocation6], %s321_s22, %s321_s22, %s322_s23  }
  0x33   :  { %314 = dma.done.wait [#allocation3], 64  }
  0x34   :  { %315 = vsyncadd [#allocation3], 4294967232 }
  0x35   :  { %316 = dma.done.wait [#allocation6], 256  }
  0x36   :  { %317 = vsyncadd [#allocation6], 4294967040  ;;  %v325_v0 = vmov 0.0   ;;  %vm326_vm0 = vmmov 0   ;;  %vm63_vm1 = vcmask 261120   ;;  %v220_v1 = vld [vmem:[#allocation5] sm:$0xff]  }
  0x37   :  { %200 = vmatprep.subr.bf16.mxu0 %v325_v0  ;;  %202 = vmatprep.mubr.msk.bf16.mxu0 %vm326_vm0, %v325_v0  ;;  %v68_v2 = vsel %vm63_vm1, %v220_v1, 0  ;;  %v55_v3 = vld [vmem:[#allocation2] sm:$0xf]  ;;  %vm111_vm2 = vcmask 130048   ;;  %v221_v15 = vld [vmem:[#allocation7] sm:$0xff]   ;;  %s327_s2 = smov [#allocation8]  }
  0x38   :  { %206 = vmatprep.subr.bf16.mxu1 %v325_v0  ;;  %208 = vmatprep.mubr.msk.bf16.mxu1 %vm326_vm0, %v325_v0  ;;  %s182_s21 = sshll.u32 %s327_s2, 4  ;;  %s183_s21 = int_to_ptr.vmem [resolvable:$true] %s182_s21 }
  0x39   :  { %201 = vmatpush3.bf16.xpose.msra.mxu0 %v68_v2  ;;  %207 = vmatpush3.bf16.msra.mxu1 %v221_v15  ;;  %s292_s22 = scalar_lea.vmem %s183_s21, 128  ;;  %p297_p11 = scmp.lt.s32.totalorder %s183_s21, %s183_s21 }
  0x3a   :  { %p293_p10 = scmp.ne.s32.totalorder %s183_s21, %s292_s22  ;;  %p298_p12 = scmp.lt.s32.totalorder %s292_s22, %s292_s22 }
  0x3c   :  { %p299_p13 = por %p298_p12, %p297_p11 }
  0x3e   :  { %p300_p0 = pnand %p299_p13, %p293_p10 }
  0x40   :  { %203 = vmatmul.mubr.msk.bf16.vlgmr.msra.gmra.mrb[0].mxu0 %vm63_vm1, %v55_v3 }
 0x113   :  { %v104_v4 = vpop.f32.mrb[0].mxu0 }
 0x114   :  { %v110_v5 = vmul.f32 0.5, %v104_v4  ;;  %v204_v6 = vpop.f32.mrb[1].mxu0 }
 0x115   :  { %v107_v7 = vpop.f32.mrb[2].mxu0 }
 0x116   :  { %v205_v8 = vpop.f32.mrb[3].mxu0  ;;  %v112_v9 = vsel %vm111_vm2, %v110_v5, -inf }
 0x117   :  { %113 = vmax.xlane.f32.xlu0 %v112_v9 }
 0x1a4   :  { %v114_v10 = vpop.xlane.xlu0 %113 }
 0x1a5   :  { %v115_v11 = vsub.f32 %v110_v5, %v114_v10 }
 0x1a7   :  { %v116_v12 = vmul.f32 1.442695, %v115_v11 }
 0x1a9   :  { %222 = vpow2.f32 %v116_v12 }
 0x1b3   :  { %v223_v13 = vpop.eup %222 }
 0x1b4   :  { %v118_v14 = vsel %vm111_vm2, %v223_v13, 0.0 }
 0x1b5   :  { %119 = vadd.xlane.f32.xlu0 %v118_v14 }
 0x242   :  { %v120_v16 = vpop.xlane.xlu0 %119 }
 0x243   :  { %224 = vrcp.f32 %v120_v16 }
 0x24d   :  { %v225_v17 = vpop.eup %224 }
 0x24e   :  { %v122_v18 = vmul.f32 %v225_v17, %v223_v13 }
 0x250   :  { %v123_v19 = vpack.c.bf16 %v122_v18, %v122_v18 }
 0x252   :  { %209 = vmatmul.mubr.msk.bf16.vlgmr.msra.gmra.mrb[0].mxu1 %vm111_vm2, %v123_v19 }
 0x325   :  { %v169_v20 = vpop.f32.mrb[0].mxu1 }
 0x326   :  { %175 = vst [vmem:[#allocation8] sm:$0xff] %v169_v20  ;;  %v210_v21 = vpop.f32.mrb[1].mxu1 }
 0x327   :  { %v172_v22 = vpop.f32.mrb[2].mxu1 }
 0x328   :  { %303 = shalt.err (!%p300_p0)
}
 0x329   :  { %s304_s25 = scalar_lea.hbm %s408_s3, 128 }
 0x32a   :  { %p305_p1 = scmp.ne.s32.totalorder %s408_s3, %s304_s25  ;;  %p308_p2 = scmp.lt.u32.totalorder %s304_s25, %s408_s3 }
 0x32c   :  { %p310_p3 = pnand %p308_p2, %p305_p1 }
 0x32e   :  { %313 = shalt.err (!%p310_p3)
}
 0x32f   :  { %185 = dma.vmem_to_hbm [thread:$0]  %s183_s21, 128, %s408_s3, [#allocation4]   ;;  %v211_v23 = vpop.f32.mrb[3].mxu1 }
 0x330   :  { %318 = dma.done.wait [#allocation4], 128  }
 0x331   :  { %319 = vsyncadd [#allocation4], 4294967168 }
 0x332   :  { %189 = vsyncpa [#allocation3], 1 }
 0x333   :  { %190 = vsyncpa [#allocation6], 1 }
 0x334   :  { %191 = vsyncpa [#allocation4], 1 }

</bundles_post_ra>
